<compile_context>
chip_gen: v7x
topology: tpu7x:2x2x1
jax: 0.10.0
libtpu: 0.0.40
codegen_flags: <defaults>
</compile_context>

<pallas_src>
import math

import jax
import jax.numpy as jnp
from jax.experimental import pallas as pl
from jax.experimental.pallas import tpu as pltpu


def _round_up(a, b):
    return ((a + b - 1) // b) * b


def _mnl_kernel(x_ref, w1_ref, b1_ref, w2_ref, b2_ref, out_ref):
    # x_ref: (TM, H) tile of flattened input rows.
    x = x_ref[...]

    # Linear(hidden -> hidden/2, lane-padded) + bias + ReLU (dropout == identity).
    h = jnp.dot(x, w1_ref[...], preferred_element_type=jnp.float32)
    h = jnp.maximum(h + b1_ref[...], 0.0)

    # hidden2tag: Linear(hidden/2 -> N_pad); N_pad is tag_size padded to a
    # 128-multiple so the store below is a full-lane (unmasked) vst.
    h = h.astype(w2_ref.dtype)
    out = jnp.dot(h, w2_ref[...], preferred_element_type=jnp.float32)
    out = out + b2_ref[...]
    out_ref[...] = out.astype(out_ref.dtype)


def multi_nonlinear_classifier(input_features, params, *, tile_m=512,
                               compute_dtype=None):
    """input_features: (..., hidden) -> (..., tag_size)."""
    w1, b1, w2, b2 = params
    *lead, hidden = input_features.shape
    h2 = w1.shape[1]
    tag_size = w2.shape[1]

    out_dtype = input_features.dtype
    cdt = compute_dtype if compute_dtype is not None else input_features.dtype

    M = int(math.prod(lead)) if lead else 1

    # Row tile: big (MXU/grid-overhead friendly) but clamped for tiny inputs.
    tm = max(8, _round_up(min(int(tile_m), M), 8))
    M_pad = _round_up(M, tm)

    x2d = input_features.reshape(M, hidden).astype(cdt)
    if M_pad != M:
        x2d = jnp.pad(x2d, ((0, M_pad - M), (0, 0)))

    # Lane-dense intermediate: pad hidden/2 to a 128-multiple with zero
    # columns in W1 / zero entries in b1 (ReLU(0) == 0) and matching zero
    # rows in W2, so both matmuls see aligned lane widths.
    h2_pad = _round_up(max(h2, 128), 128)
    # Lane-dense head: pad tag_size to a 128-multiple with zero columns.
    n_pad = _round_up(max(tag_size, 128), 128)

    w1p = jnp.zeros((hidden, h2_pad), cdt).at[:, :h2].set(w1.astype(cdt))
    b1p = jnp.zeros((1, h2_pad), jnp.float32).at[:, :h2].set(
        b1.astype(jnp.float32))
    w2p = jnp.zeros((h2_pad, n_pad), cdt).at[:h2, :tag_size].set(
        w2.astype(cdt))
    b2p = jnp.zeros((1, n_pad), jnp.float32).at[:, :tag_size].set(
        b2.astype(jnp.float32))

    grid = (M_pad // tm,)

    # VMEM budget: double-buffered x/out tiles + resident weights + headroom.
    in_item = jnp.dtype(cdt).itemsize
    out_item = jnp.dtype(out_dtype).itemsize
    est = (2 * tm * hidden * in_item                        # x tiles (double-buffered)
           + (hidden * h2_pad + h2_pad * n_pad) * in_item   # weights (resident)
           + (h2_pad + n_pad) * 4                           # biases
           + 2 * tm * n_pad * out_item                      # output tiles
           + 4 * tm * max(h2_pad, n_pad) * 4)               # f32 intermediates
    vmem_limit = int(min(48 * (1 << 20), max(est * 2, 4 * (1 << 20))))

    flops = 2 * M_pad * (hidden * h2_pad + h2_pad * n_pad)
    bytes_accessed = (M_pad * hidden * in_item
                      + (hidden * h2_pad + h2_pad * n_pad) * in_item
                      + M_pad * n_pad * out_item)

    out2d = pl.pallas_call(
        _mnl_kernel,
        out_shape=jax.ShapeDtypeStruct((M_pad, n_pad), out_dtype),
        grid=grid,
        in_specs=[
            pl.BlockSpec((tm, hidden), lambda i: (i, 0)),     # x rows
            pl.BlockSpec((hidden, h2_pad), lambda i: (0, 0)), # W1 (lane-padded)
            pl.BlockSpec((1, h2_pad), lambda i: (0, 0)),      # b1 (lane-padded)
            pl.BlockSpec((h2_pad, n_pad), lambda i: (0, 0)),  # W2 (lane-padded)
            pl.BlockSpec((1, n_pad), lambda i: (0, 0)),       # b2 (lane-padded)
        ],
        out_specs=pl.BlockSpec((tm, n_pad), lambda i: (i, 0)),
        compiler_params=pltpu.CompilerParams(
            dimension_semantics=("parallel",),
            vmem_limit_bytes=vmem_limit),
        cost_estimate=pl.CostEstimate(
            flops=flops, transcendentals=0, bytes_accessed=bytes_accessed),
    )(x2d, w1p, b1p, w2p, b2p)

    out = out2d[:M, :tag_size]
    return out.reshape(*lead, tag_size)


def init_params(key, hidden_size, tag_size, dtype=jnp.float32):
    """Deterministic synthetic init (uniform, like torch.nn.Linear default).
    Weights are stored (in_features, out_features)."""
    h2 = hidden_size // 2
    keys = jax.random.split(key, 4)

    def lin(kw, kb, fan_in, fan_out):
        bound = 1.0 / (fan_in ** 0.5)
        w = jax.random.uniform(kw, (fan_in, fan_out), dtype, -bound, bound)
        b = jax.random.uniform(kb, (fan_out,), dtype, -bound, bound)
        return w, b

    w1, b1 = lin(keys[0], keys[1], hidden_size, h2)
    w2, b2 = lin(keys[2], keys[3], h2, tag_size)
    return (w1, b1, w2, b2)


def _reference(x, params):
    w1, b1, w2, b2 = params
    h = jnp.maximum(x @ w1 + b1, 0.0)
    return h @ w2 + b2


if __name__ == "__main__":
    # Small shapes consistent with the module's forward: (bs, seq_len, hidden).
    bs, seq_len, hidden_size, tag_size = 2, 8, 32, 5
    # TODO(synk): nn.Dropout has no deterministic Pallas equivalent at train
    # time; we implement inference (dropout == identity).

    key = jax.random.PRNGKey(0)
    k_x, k_p = jax.random.split(key)
    x = jax.random.normal(k_x, (bs, seq_len, hidden_size), jnp.float32)
    params = init_params(k_p, hidden_size, tag_size)

    # f32 operands (bit-exact-ish vs pure-JAX reference).
    out_f32 = multi_nonlinear_classifier(x, params)
    out_f32 = jax.block_until_ready(out_f32)

    # bf16 operands / f32 accumulation (fast MXU path on v6e/v7x).
    out_bf16 = multi_nonlinear_classifier(x, params, compute_dtype=jnp.bfloat16)
    out_bf16 = jax.block_until_ready(out_bf16)

    ref = _reference(x, params)
    assert out_f32.shape == (bs, seq_len, tag_size)
    assert out_bf16.shape == (bs, seq_len, tag_size)
    assert jnp.allclose(out_f32, ref, atol=1e-5, rtol=1e-5)
    assert jnp.allclose(out_bf16, ref, atol=5e-2, rtol=5e-2)

    print("KERNEL_OK")
</pallas_src>

<mosaic_0001>
module attributes {stable_mosaic.version = 11 : i64} {
  func.func @_mnl_kernel(%arg0: i32, %arg1: memref<16x32xf32, #tpu.memory_space<vmem>>, %arg2: memref<32x128xf32, #tpu.memory_space<vmem>>, %arg3: memref<1x128xf32, #tpu.memory_space<vmem>>, %arg4: memref<128x128xf32, #tpu.memory_space<vmem>>, %arg5: memref<1x128xf32, #tpu.memory_space<vmem>>, %arg6: memref<16x128xf32, #tpu.memory_space<vmem>>) attributes {dimension_semantics = [#tpu.dimension_semantics<parallel>], iteration_bounds = array<i64: 1>, scalar_prefetch = 0 : i64, scratch_operands = 0 : i64, tpu.core_type = #tpu.core_type<tc>, window_params = [{transform_indices = @transform_0, window_bounds = array<i64: 16, 32>}, {pipeline_mode = #tpu.pipeline_mode<synchronous>, transform_indices = @transform_1, window_bounds = array<i64: 32, 128>}, {pipeline_mode = #tpu.pipeline_mode<synchronous>, transform_indices = @transform_2, window_bounds = array<i64: 1, 128>}, {pipeline_mode = #tpu.pipeline_mode<synchronous>, transform_indices = @transform_3, window_bounds = array<i64: 128, 128>}, {pipeline_mode = #tpu.pipeline_mode<synchronous>, transform_indices = @transform_4, window_bounds = array<i64: 1, 128>}, {transform_indices = @transform_5, window_bounds = array<i64: 16, 128>}]} {
    %c0 = arith.constant 0 : index
    %c0_0 = arith.constant 0 : index
    %0 = vector.load %arg1[%c0, %c0_0] : memref<16x32xf32, #tpu.memory_space<vmem>>, vector<16x32xf32>
    %c0_1 = arith.constant 0 : index
    %c0_2 = arith.constant 0 : index
    %1 = vector.load %arg2[%c0_1, %c0_2] : memref<32x128xf32, #tpu.memory_space<vmem>>, vector<32x128xf32>
    %cst = arith.constant dense<0.000000e+00> : vector<16x128xf32>
    %2 = tpu.matmul %0, %1, %cst {dimension_numbers = #tpu.dot_dimension_numbers<[1], [0], [0], [1], [0, 0, 1, 1], [], []>} : vector<16x32xf32>, vector<32x128xf32>, vector<16x128xf32> -> vector<16x128xf32>
    %c0_3 = arith.constant 0 : index
    %c0_4 = arith.constant 0 : index
    %3 = vector.load %arg3[%c0_3, %c0_4] : memref<1x128xf32, #tpu.memory_space<vmem>>, vector<1x128xf32>
    %4 = vector.broadcast %3 : vector<1x128xf32> to vector<16x128xf32>
    %5 = arith.addf %2, %4 : vector<16x128xf32>
    %cst_5 = arith.constant 0.000000e+00 : f32
    %6 = vector.broadcast %cst_5 : f32 to vector<16x128xf32>
    %7 = arith.maximumf %5, %6 : vector<16x128xf32>
    %c0_6 = arith.constant 0 : index
    %c0_7 = arith.constant 0 : index
    %8 = vector.load %arg4[%c0_6, %c0_7] : memref<128x128xf32, #tpu.memory_space<vmem>>, vector<128x128xf32>
    %cst_8 = arith.constant dense<0.000000e+00> : vector<16x128xf32>
    %9 = tpu.matmul %7, %8, %cst_8 {dimension_numbers = #tpu.dot_dimension_numbers<[1], [0], [0], [1], [0, 0, 1, 1], [], []>} : vector<16x128xf32>, vector<128x128xf32>, vector<16x128xf32> -> vector<16x128xf32>
    %c0_9 = arith.constant 0 : index
    %c0_10 = arith.constant 0 : index
    %10 = vector.load %arg5[%c0_9, %c0_10] : memref<1x128xf32, #tpu.memory_space<vmem>>, vector<1x128xf32>
    %11 = vector.broadcast %10 : vector<1x128xf32> to vector<16x128xf32>
    %12 = arith.addf %9, %11 : vector<16x128xf32>
    %c0_11 = arith.constant 0 : index
    %c0_12 = arith.constant 0 : index
    %13 = vector.load %arg6[%c0_11, %c0_12] : memref<16x128xf32, #tpu.memory_space<vmem>>, vector<16x128xf32>
    tpu.vector_store %arg6[%c0_11, %c0_12], %12 {strides = array<i32>} : memref<16x128xf32, #tpu.memory_space<vmem>>, vector<16x128xf32>,
    return
  }
  func.func @transform_0(%arg0: i32) -> (i32, i32) {
    %c0_i32 = arith.constant 0 : i32
    %c0_i32_0 = arith.constant 0 : i32
    return %arg0, %c0_i32 : i32, i32
  }
  func.func @transform_1(%arg0: i32) -> (i32, i32) {
    %c0_i32 = arith.constant 0 : i32
    %c0_i32_0 = arith.constant 0 : i32
    %c0_i32_1 = arith.constant 0 : i32
    return %c0_i32, %c0_i32_0 : i32, i32
  }
  func.func @transform_2(%arg0: i32) -> (i32, i32) {
    %c0_i32 = arith.constant 0 : i32
    %c0_i32_0 = arith.constant 0 : i32
    %c0_i32_1 = arith.constant 0 : i32
    return %c0_i32, %c0_i32_0 : i32, i32
  }
  func.func @transform_3(%arg0: i32) -> (i32, i32) {
    %c0_i32 = arith.constant 0 : i32
    %c0_i32_0 = arith.constant 0 : i32
    %c0_i32_1 = arith.constant 0 : i32
    return %c0_i32, %c0_i32_0 : i32, i32
  }
  func.func @transform_4(%arg0: i32) -> (i32, i32) {
    %c0_i32 = arith.constant 0 : i32
    %c0_i32_0 = arith.constant 0 : i32
    %c0_i32_1 = arith.constant 0 : i32
    return %c0_i32, %c0_i32_0 : i32, i32
  }
  func.func @transform_5(%arg0: i32) -> (i32, i32) {
    %c0_i32 = arith.constant 0 : i32
    %c0_i32_0 = arith.constant 0 : i32
    return %arg0, %c0_i32 : i32, i32
  }
}

</mosaic_0001>

<bundles_post_ra>
// kernel: tpu_custom_call.1
= control target key start
LH: loop header
LB: loop body
LE: loop exit
PB: predicated region body
PF: predicated region fallthrough
CT: control target
= control target key end

     0   :  { %10 = vsyncpa [#allocation3], 0  ;;  %s602_s0 = inlined_call_operand.hbm [shape: f32[16,32], index: 0, kind: input, shape index: {}]   ;;  %s603_s1 = inlined_call_operand.hbm [shape: f32[32,128], index: 1, kind: input, shape index: {}]   ;;  %s604_s2 = inlined_call_operand.vmem [shape: f32[1,128], index: 2, kind: input, shape index: {}]   ;;  %s605_s3 = inlined_call_operand.hbm [shape: f32[128,128], index: 3, kind: input, shape index: {}]   ;;  %s606_s4 = inlined_call_operand.vmem [shape: f32[1,128], index: 4, kind: input, shape index: {}]   ;;  %s607_s5 = inlined_call_operand.hbm [shape: f32[16,128], index: 5, kind: output, shape index: {}]  }
   0x1   :  { %11 = vsyncpa [#allocation6], 0 }
   0x2   :  { %12 = vsyncpa [#allocation4], 0  ;;  %s491_s18 = smov [#allocation5]   ;;  %s492_s20 = smov [#allocation2]  }
   0x3   :  { %s30_s19 = sshll.u32 %s491_s18, 4  ;;  %s18_s21 = sshll.u32 %s492_s20, 4  ;;  %s31_s19 = int_to_ptr.vmem [resolvable:$true] %s30_s19  ;;  %s527_s21 = int_to_ptr.vmem [resolvable:$true] %s18_s21 }
   0x4   :  { %s397_s24 = scalar_lea.hbm %s603_s1, 512 }
   0x5   :  { %p398_p0 = scmp.ne.s32.totalorder %s603_s1, %s397_s24  ;;  %p401_p1 = scmp.lt.u32.totalorder %s397_s24, %s603_s1 }
   0x7   :  { %p403_p2 = pnand %p401_p1, %p398_p0 }
   0x9   :  { %406 = shalt.err (!%p403_p2)
}
   0xa   :  { %s407_s29 = scalar_lea.vmem %s31_s19, 512  ;;  %p412_p4 = scmp.lt.s32.totalorder %s31_s19, %s31_s19 }
   0xb   :  { %p408_p3 = scmp.ne.s32.totalorder %s31_s19, %s407_s29  ;;  %p413_p5 = scmp.lt.s32.totalorder %s407_s29, %s407_s29 }
   0xd   :  { %p414_p6 = por %p413_p5, %p412_p4 }
   0xf   :  { %p415_p7 = pnand %p414_p6, %p408_p3 }
  0x11   :  { %418 = shalt.err (!%p415_p7)
}
  0x12   :  { %s493_s30 = smov 128   ;;  %s494_s6 = smov 8  }
  0x13   :  { %36 = dma.hbm_to_vmem [thread:$0]  %s603_s1, 512, %s31_s19, [#allocation6], %s493_s30, %s493_s30, %s494_s6  }
  0x14   :  { %s419_s11 = scalar_lea.hbm %s602_s0, 256 }
  0x15   :  { %p420_p8 = scmp.ne.s32.totalorder %s602_s0, %s419_s11  ;;  %p423_p9 = scmp.lt.u32.totalorder %s419_s11, %s602_s0 }
  0x17   :  { %p425_p10 = pnand %p423_p9, %p420_p8 }
  0x19   :  { %428 = shalt.err (!%p425_p10)
}
  0x1a   :  { %s429_s16 = scalar_lea.vmem %s527_s21, 256  ;;  %p434_p12 = scmp.lt.s32.totalorder %s527_s21, %s527_s21 }
  0x1b   :  { %p430_p11 = scmp.ne.s32.totalorder %s527_s21, %s429_s16  ;;  %p435_p13 = scmp.lt.s32.totalorder %s429_s16, %s429_s16 }
  0x1d   :  { %p436_p0 = por %p435_p13, %p434_p12 }
  0x1f   :  { %p437_p1 = pnand %p436_p0, %p430_p11 }
  0x21   :  { %440 = shalt.err (!%p437_p1)
}
  0x22   :  { %24 = dma.hbm_to_vmem [thread:$0]  %s602_s0, 256, %s527_s21, [#allocation3], %s493_s30, %s493_s30, %s494_s6  }
  0x23   :  { %s495_s18 = smov [#allocation7]   ;;  %s441_s23 = scalar_lea.hbm %s605_s3, 2048 }
  0x24   :  { %s44_s19 = sshll.u32 %s495_s18, 4  ;;  %p442_p2 = scmp.ne.s32.totalorder %s605_s3, %s441_s23  ;;  %s45_s19 = int_to_ptr.vmem [resolvable:$true] %s44_s19 }
  0x25   :  { %p445_p3 = scmp.lt.u32.totalorder %s441_s23, %s605_s3 }
  0x27   :  { %p447_p4 = pnand %p445_p3, %p442_p2 }
  0x29   :  { %450 = shalt.err (!%p447_p4)
}
  0x2a   :  { %s451_s28 = scalar_lea.vmem %s45_s19, 2048  ;;  %p456_p6 = scmp.lt.s32.totalorder %s45_s19, %s45_s19 }
  0x2b   :  { %p452_p5 = scmp.ne.s32.totalorder %s45_s19, %s451_s28  ;;  %p457_p7 = scmp.lt.s32.totalorder %s451_s28, %s451_s28 }
  0x2d   :  { %p458_p8 = por %p457_p7, %p456_p6 }
  0x2f   :  { %p459_p9 = pnand %p458_p8, %p452_p5 }
  0x31   :  { %462 = shalt.err (!%p459_p9)
}
  0x32   :  { %50 = dma.hbm_to_vmem [thread:$0]  %s605_s3, 2048, %s45_s19, [#allocation6], %s493_s30, %s493_s30, %s494_s6  }
  0x33   :  { %485 = dma.done.wait [#allocation3], 256  }
  0x34   :  { %486 = vsyncadd [#allocation3], 4294967040 }
  0x35   :  { %487 = dma.done.wait [#allocation6], 2560  }
  0x36   :  { %488 = vsyncadd [#allocation6], 4294964736  ;;  %vm75_vm0 = vcmask 261120   ;;  %v64_v0 = vld [vmem:[#allocation5] sm:$0xff]  ;;  %v65_v1 = vld [vmem:[#allocation5 + $0x8] sm:$0xff]  ;;  %s496_s9 = smov [#allocation8]  }
  0x37   :  { %v66_v2 = vld [vmem:[#allocation5 + $0x10] sm:$0xff]  ;;  %v351_v3 = vpack.c.bf16 %v65_v1, %v64_v0  ;;  %v67_v4 = vld [vmem:[#allocation5 + $0x18] sm:$0xff]  ;;  %v159_v7 = vld [vmem:[#allocation7] sm:$0xff]  ;;  %s264_s10 = sshll.u32 %s496_s9, 4  ;;  %s265_s10 = int_to_ptr.vmem [resolvable:$true] %s264_s10 }
  0x38   :  { %v62_v5 = vld [vmem:[#allocation2] sm:$0xff]  ;;  %v355_v6 = vpack.c.bf16 %v67_v4, %v66_v2  ;;  %v160_v8 = vld [vmem:[#allocation7 + $0x8] sm:$0xff]  ;;  %v162_v11 = vld [vmem:[#allocation7 + $0x18] sm:$0xff]  ;;  %p468_p11 = scmp.lt.s32.totalorder %s265_s10, %s265_s10 }
  0x39   :  { %313 = vmatprep.mubr.msk.f32.mxu0 %vm75_vm0, %v62_v5  ;;  %v161_v9 = vld [vmem:[#allocation7 + $0x10] sm:$0xff]  ;;  %352 = vmatprep.subr.bf16.mxu0 %v351_v3  ;;  %v359_v10 = vpack.c.bf16 %v160_v8, %v159_v7  ;;  %v163_v13 = vld [vmem:[#allocation7 + $0x20] sm:$0xff]  ;;  %v164_v14 = vld [vmem:[#allocation7 + $0x28] sm:$0xff] }
  0x3a   :  { %354 = vmatpush3.bf16.msra.mxu0 %v351_v3  ;;  %v363_v12 = vpack.c.bf16 %v162_v11, %v161_v9  ;;  %v367_v15 = vpack.c.bf16 %v164_v14, %v163_v13  ;;  %v63_v16 = vld [vmem:[#allocation2 + $0x8] sm:$0xff]  ;;  %v165_v17 = vld [vmem:[#allocation7 + $0x30] sm:$0xff]  ;;  %v167_v20 = vld [vmem:[#allocation7 + $0x40] sm:$0xff] }
  0x3b   :  { %356 = vmatprep.subr.bf16.mxu0 %v355_v6  ;;  %360 = vmatprep.subr.bf16.mxu1 %v359_v10  ;;  %v166_v18 = vld [vmem:[#allocation7 + $0x38] sm:$0xff]  ;;  %v168_v21 = vld [vmem:[#allocation7 + $0x48] sm:$0xff]  ;;  %v169_v23 = vld [vmem:[#allocation7 + $0x50] sm:$0xff] }
  0x3c   :  { %362 = vmatpush3.bf16.msra.mxu1 %v359_v10  ;;  %v371_v19 = vpack.c.bf16 %v166_v18, %v165_v17  ;;  %v375_v22 = vpack.c.bf16 %v168_v21, %v167_v20  ;;  %v170_v24 = vld [vmem:[#allocation7 + $0x58] sm:$0xff]  ;;  %v171_v26 = vld [vmem:[#allocation7 + $0x60] sm:$0xff]  ;;  %v172_v27 = vld [vmem:[#allocation7 + $0x68] sm:$0xff] }
  0x3d   :  { %364 = vmatprep.subr.bf16.mxu1 %v363_v12  ;;  %v379_v25 = vpack.c.bf16 %v170_v24, %v169_v23  ;;  %v383_v28 = vpack.c.bf16 %v172_v27, %v171_v26  ;;  %v173_v29 = vld [vmem:[#allocation7 + $0x70] sm:$0xff]  ;;  %v174_v30 = vld [vmem:[#allocation7 + $0x78] sm:$0xff] }
  0x3e   :  { %358 = vmatpush3.bf16.msra.mxu0 %v355_v6  ;;  %v387_v31 = vpack.c.bf16 %v174_v30, %v173_v29  ;;  %v277_v32 = vld [vmem:[%s604_s2] ss:$0 sm:$0xff]  ;;  %s463_s2 = scalar_lea.vmem %s265_s10, 256 }
  0x3f   :  { %v280_v39 = vld [vmem:[%s606_s4] ss:$0 sm:$0xff]  ;;  %p464_p10 = scmp.ne.s32.totalorder %s265_s10, %s463_s2  ;;  %p469_p12 = scmp.lt.s32.totalorder %s463_s2, %s463_s2 }
  0x40   :  { %366 = vmatpush3.bf16.msra.mxu1 %v363_v12 }
  0x41   :  { %314 = vmatmul.mubr.msk.f32.vlgmr.msra.gmra.mrb[0].mxu0 %vm75_vm0, %v63_v16  ;;  %368 = vmatprep.subr.bf16.mxu1 %v367_v15  ;;  %p470_p13 = por %p469_p12, %p468_p11 }
  0x43   :  { %p471_p0 = pnand %p470_p13, %p464_p10 }
  0x44   :  { %370 = vmatpush3.bf16.msra.mxu1 %v367_v15 }
  0x45   :  { %372 = vmatprep.subr.bf16.mxu1 %v371_v19 }
  0x48   :  { %374 = vmatpush3.bf16.msra.mxu1 %v371_v19 }
  0x49   :  { %376 = vmatprep.subr.bf16.mxu1 %v375_v22 }
  0x4c   :  { %378 = vmatpush3.bf16.msra.mxu1 %v375_v22 }
  0x4d   :  { %380 = vmatprep.subr.bf16.mxu1 %v379_v25 }
  0x50   :  { %382 = vmatpush3.bf16.msra.mxu1 %v379_v25 }
  0x51   :  { %384 = vmatprep.subr.bf16.mxu1 %v383_v28 }
  0x54   :  { %386 = vmatpush3.bf16.msra.mxu1 %v383_v28 }
  0x55   :  { %388 = vmatprep.subr.bf16.mxu1 %v387_v31 }
  0x58   :  { %390 = vmatpush3.bf16.msra.mxu1 %v387_v31 }
 0x114   :  { %v315_v33 = vpop.f32.mrb[0].mxu0 }
 0x115   :  { %v154_v34 = vadd.f32 %v315_v33, %v277_v32  ;;  %v148_v35 = vpop.f32.mrb[1].mxu0 }
 0x116   :  { %v149_v36 = vadd.f32 %v277_v32, %v148_v35 }
 0x117   :  { %v158_v38 = vmax.f32 %v154_v34, 0.0 }
 0x118   :  { %v157_v37 = vmax.f32 %v149_v36, 0.0 }
 0x11a   :  { %348 = vmatprep.mubr.f32.mxu1 %v157_v37 }
 0x11b   :  { %349 = vmatmul.mubr.f32.vlgmr.msra.gmra.mrb[0].mxu1 %v158_v38 }
 0x1ee   :  { %v350_v40 = vpop.f32.mrb[0].mxu1 }
 0x1ef   :  { %v254_v41 = vadd.f32 %v350_v40, %v280_v39  ;;  %v248_v42 = vpop.f32.mrb[1].mxu1 }
 0x1f0   :  { %v249_v43 = vadd.f32 %v280_v39, %v248_v42 }
 0x1f1   :  { %258 = vst [vmem:[#allocation8 + $0x8] sm:$0xff] %v254_v41 }
 0x1f2   :  { %257 = vst [vmem:[#allocation8] sm:$0xff] %v249_v43 }
 0x1f3   :  { %474 = shalt.err (!%p471_p0)
}
 0x1f4   :  { %s475_s4 = scalar_lea.hbm %s607_s5, 256 }
 0x1f5   :  { %p476_p1 = scmp.ne.s32.totalorder %s607_s5, %s475_s4  ;;  %p479_p2 = scmp.lt.u32.totalorder %s475_s4, %s607_s5 }
 0x1f7   :  { %p481_p3 = pnand %p479_p2, %p476_p1 }
 0x1f9   :  { %484 = shalt.err (!%p481_p3)
}
 0x1fa   :  { %270 = dma.vmem_to_hbm [thread:$0]  %s265_s10, 256, %s607_s5, [#allocation4], %s493_s30, %s493_s30, %s494_s6  }
 0x1fb   :  { %489 = dma.done.wait [#allocation4], 256  }
 0x1fc   :  { %490 = vsyncadd [#allocation4], 4294967040 }
 0x1fd   :  { %274 = vsyncpa [#allocation3], 1 }
 0x1fe   :  { %275 = vsyncpa [#allocation6], 1 }
 0x1ff   :  { %276 = vsyncpa [#allocation4], 1 }

</bundles_post_ra>
